<compile_context>
chip_gen: v7x
topology: tpu7x:2x2x1
jax: 0.10.0
libtpu: 0.0.40
codegen_flags: <defaults>
</compile_context>

<pallas_src>
import jax
import jax.numpy as jnp
from jax.experimental import pallas as pl
from jax.experimental.pallas import tpu as pltpu


def _cwa_kernel(x_ref, w1_ref, b1_ref, w2_ref, b2_ref, out_ref):
    # Time-axis SUM (1/L is folded into w1).  Upcast to f32 before the reduce so
    # bf16-streamed inputs accumulate in f32 and v5e (no bf16 VPU) stays happy.
    s = jnp.sum(x_ref[...].astype(jnp.float32), axis=-1)                # (TB, C)

    # fc1 -> tanh (tanh lowers to the EUP slot; overlaps VPU/MXU work).
    t = jnp.tanh(jnp.dot(s, w1_ref[...], preferred_element_type=jnp.float32)
                 + b1_ref[...])                                          # (TB, H)

    # fc2
    v = (jnp.dot(t, w2_ref[...], preferred_element_type=jnp.float32)
         + b2_ref[...])                                                  # (TB, C)

    # Channel softmax (per row), single-reciprocal form (exact, holds 1e-5).
    v = v - jnp.max(v, axis=-1, keepdims=True)
    e = jnp.exp(v)
    inv = pl.reciprocal(jnp.sum(e, axis=-1, keepdims=True), approx=False)
    out_ref[...] = (e * inv).astype(out_ref.dtype)


def prepare_params(params, seq_len):
    """One-time layout prep (outside the hot path):
       * (out,in) -> (in,out) weights, (1,out) bias rows (no per-call transposes)
       * the 1/L mean scale is folded into w1 so the kernel only sums over time.
    """
    inv_l = jnp.float32(1.0 / seq_len)
    return {
        "w1t": jnp.asarray(params["w1"], jnp.float32).T * inv_l,   # (C, H), pre-scaled
        "b1r": jnp.asarray(params["b1"], jnp.float32).reshape(1, -1),   # (1, H)
        "w2t": jnp.asarray(params["w2"], jnp.float32).T,                # (H, C)
        "b2r": jnp.asarray(params["b2"], jnp.float32).reshape(1, -1),   # (1, C)
    }


# Conservative x-tile budget: double-buffered x tile must fit well under the
# smallest scoped VMEM we raise to (48 MiB), itself under v7x's 64 MiB physical.
_X_TILE_VMEM_BUDGET = 24 * 1024 * 1024
_VMEM_LIMIT_BYTES = 48 * 1024 * 1024


def _pick_batch_tile(B, C, L, itemsize, block_b=None):
    """Largest batch tile whose double-buffered x block fits the VMEM budget,
    clamped to B (collapses the grid for small B).  Multiple of 8 when < B."""
    if block_b is None:
        per_row = 2 * C * L * itemsize                 # double-buffered bytes/row
        tb = max(8, (_X_TILE_VMEM_BUDGET // per_row) // 8 * 8)
    else:
        tb = max(1, block_b)
    tb = min(tb, B)
    if tb < B:
        tb = max(8, (tb // 8) * 8)                     # sublane-aligned tiles
    return tb


def channel_wise_attention(x, prepped, *, block_b=None):
    """x: (B, C, L) float32 or bfloat16. prepped: output of prepare_params.
    Returns (B, C) float32 channel-attention weights (rows sum to 1)."""
    B, C, L = x.shape
    H = prepped["w1t"].shape[1]
    itemsize = jnp.dtype(x.dtype).itemsize

    tb = _pick_batch_tile(B, C, L, itemsize, block_b)

    # cdiv tiling; pad the ragged tail (softmax is per-row, padded rows dropped).
    n_steps = pl.cdiv(B, tb)
    Bp = n_steps * tb
    if Bp != B:
        x = jnp.pad(x, ((0, Bp - B), (0, 0), (0, 0)))

    # Only split across v7x's two TensorCores when each gets meaningful work.
    semantics = ("parallel",) if n_steps >= 4 else ("arbitrary",)

    const = lambda i: (0, 0)                           # resident weights/biases
    out = pl.pallas_call(
        _cwa_kernel,
        out_shape=jax.ShapeDtypeStruct((Bp, C), jnp.float32),
        grid=(n_steps,),
        in_specs=[
            pl.BlockSpec((tb, C, L), lambda i: (i, 0, 0)),  # x batch tile
            pl.BlockSpec((C, H), const),                    # fc1 weight (resident)
            pl.BlockSpec((1, H), const),                    # fc1 bias   (resident)
            pl.BlockSpec((H, C), const),                    # fc2 weight (resident)
            pl.BlockSpec((1, C), const),                    # fc2 bias   (resident)
        ],
        out_specs=pl.BlockSpec((tb, C), lambda i: (i, 0)),
        compiler_params=pltpu.CompilerParams(
            dimension_semantics=semantics,
            vmem_limit_bytes=_VMEM_LIMIT_BYTES),
    )(x, prepped["w1t"], prepped["b1r"], prepped["w2t"], prepped["b2r"])

    return out[:B] if Bp != B else out


def init_params(key, num_channels, ratio=4):
    """PyTorch-convention parameters for fc1/fc2 (nn.Linear default init)."""
    num_hidden = max(1, num_channels // ratio)
    ks = jax.random.split(key, 4)
    s1 = 1.0 / (num_channels ** 0.5)
    s2 = 1.0 / (num_hidden ** 0.5)
    return {
        "w1": jax.random.uniform(ks[0], (num_hidden, num_channels), jnp.float32, -s1, s1),
        "b1": jax.random.uniform(ks[1], (num_hidden,), jnp.float32, -s1, s1),
        "w2": jax.random.uniform(ks[2], (num_channels, num_hidden), jnp.float32, -s2, s2),
        "b2": jax.random.uniform(ks[3], (num_channels,), jnp.float32, -s2, s2),
    }


def _reference(x, p):
    """Pure-JAX reference mirroring the PyTorch forward."""
    h = jnp.mean(x, axis=-1)
    t = jnp.tanh(h @ p["w1"].T + p["b1"])
    v = t @ p["w2"].T + p["b2"]
    return jax.nn.softmax(v, axis=-1)


if __name__ == "__main__":
    B, C, L = 16, 32, 64            # batch, EEG channels, time samples
    key = jax.random.PRNGKey(0)
    kx, kp = jax.random.split(key)
    x = jax.random.normal(kx, (B, C, L), dtype=jnp.float32)

    params = init_params(kp, C, ratio=4)
    prepped = prepare_params(params, L)     # one-time layout prep + 1/L fold
    ref = _reference(x, params)

    # f32 streaming path: grid collapses to a single step; tight reference check.
    out = jax.block_until_ready(channel_wise_attention(x, prepped))
    assert out.shape == (B, C)
    assert jnp.allclose(out, ref, atol=1e-5, rtol=1e-5)
    assert jnp.allclose(jnp.sum(out, axis=-1), 1.0, atol=1e-5)

    # bf16 streaming path: halves x's HBM bytes (the kernel's roofline);
    # f32 accumulation inside the kernel, so only a looser check is needed.
    out_bf16 = jax.block_until_ready(
        channel_wise_attention(x.astype(jnp.bfloat16), prepped))
    assert out_bf16.shape == (B, C)
    assert jnp.allclose(out_bf16, ref, atol=5e-3, rtol=5e-3)

    # Ragged-batch path (exercises cdiv tiling + padding + tail slice).
    out_ragged = jax.block_until_ready(
        channel_wise_attention(x[:11], prepped, block_b=8))
    assert out_ragged.shape == (11, C)
    assert jnp.allclose(out_ragged, ref[:11], atol=1e-5, rtol=1e-5)

    print("KERNEL_OK")
</pallas_src>

<mosaic_0001>
module attributes {stable_mosaic.version = 11 : i64} {
  func.func @_cwa_kernel(%arg0: i32, %arg1: memref<16x32x64xf32, #tpu.memory_space<vmem>>, %arg2: memref<32x8xf32, #tpu.memory_space<vmem>>, %arg3: memref<1x8xf32, #tpu.memory_space<vmem>>, %arg4: memref<8x32xf32, #tpu.memory_space<vmem>>, %arg5: memref<1x32xf32, #tpu.memory_space<vmem>>, %arg6: memref<16x32xf32, #tpu.memory_space<vmem>>) attributes {dimension_semantics = [#tpu.dimension_semantics<arbitrary>], iteration_bounds = array<i64: 1>, scalar_prefetch = 0 : i64, scratch_operands = 0 : i64, tpu.core_type = #tpu.core_type<tc>, window_params = [{transform_indices = @transform_0, window_bounds = array<i64: 16, 32, 64>}, {pipeline_mode = #tpu.pipeline_mode<synchronous>, transform_indices = @transform_1, window_bounds = array<i64: 32, 8>}, {pipeline_mode = #tpu.pipeline_mode<synchronous>, transform_indices = @transform_2, window_bounds = array<i64: 1, 8>}, {pipeline_mode = #tpu.pipeline_mode<synchronous>, transform_indices = @transform_3, window_bounds = array<i64: 8, 32>}, {pipeline_mode = #tpu.pipeline_mode<synchronous>, transform_indices = @transform_4, window_bounds = array<i64: 1, 32>}, {transform_indices = @transform_5, window_bounds = array<i64: 16, 32>}]} {
    %c0 = arith.constant 0 : index
    %c0_0 = arith.constant 0 : index
    %c0_1 = arith.constant 0 : index
    %0 = vector.load %arg1[%c0, %c0_0, %c0_1] : memref<16x32x64xf32, #tpu.memory_space<vmem>>, vector<16x32x64xf32>
    %cst = arith.constant dense<0.000000e+00> : vector<16x32xf32>
    %1 = vector.multi_reduction <add>, %0, %cst [2] : vector<16x32x64xf32> to vector<16x32xf32>
    %c0_2 = arith.constant 0 : index
    %c0_3 = arith.constant 0 : index
    %2 = vector.load %arg2[%c0_2, %c0_3] : memref<32x8xf32, #tpu.memory_space<vmem>>, vector<32x8xf32>
    %cst_4 = arith.constant dense<0.000000e+00> : vector<16x8xf32>
    %3 = tpu.matmul %1, %2, %cst_4 {dimension_numbers = #tpu.dot_dimension_numbers<[1], [0], [0], [1], [0, 0, 1, 1], [], []>} : vector<16x32xf32>, vector<32x8xf32>, vector<16x8xf32> -> vector<16x8xf32>
    %c0_5 = arith.constant 0 : index
    %c0_6 = arith.constant 0 : index
    %4 = vector.load %arg3[%c0_5, %c0_6] : memref<1x8xf32, #tpu.memory_space<vmem>>, vector<1x8xf32>
    %5 = vector.broadcast %4 : vector<1x8xf32> to vector<16x8xf32>
    %6 = arith.addf %3, %5 : vector<16x8xf32>
    %7 = math.tanh %6 : vector<16x8xf32>
    %c0_7 = arith.constant 0 : index
    %c0_8 = arith.constant 0 : index
    %8 = vector.load %arg4[%c0_7, %c0_8] : memref<8x32xf32, #tpu.memory_space<vmem>>, vector<8x32xf32>
    %cst_9 = arith.constant dense<0.000000e+00> : vector<16x32xf32>
    %9 = tpu.matmul %7, %8, %cst_9 {dimension_numbers = #tpu.dot_dimension_numbers<[1], [0], [0], [1], [0, 0, 1, 1], [], []>} : vector<16x8xf32>, vector<8x32xf32>, vector<16x32xf32> -> vector<16x32xf32>
    %c0_10 = arith.constant 0 : index
    %c0_11 = arith.constant 0 : index
    %10 = vector.load %arg5[%c0_10, %c0_11] : memref<1x32xf32, #tpu.memory_space<vmem>>, vector<1x32xf32>
    %11 = vector.broadcast %10 : vector<1x32xf32> to vector<16x32xf32>
    %12 = arith.addf %9, %11 : vector<16x32xf32>
    %cst_12 = arith.constant dense<0xFF800000> : vector<16xf32>
    %13 = vector.multi_reduction <maximumf>, %12, %cst_12 [1] : vector<16x32xf32> to vector<16xf32>
    %14 = vector.shape_cast %13 : vector<16xf32> to vector<16x1xf32>
    %15 = vector.broadcast %14 : vector<16x1xf32> to vector<16x32xf32>
    %16 = arith.subf %12, %15 : vector<16x32xf32>
    %17 = math.exp %16 : vector<16x32xf32>
    %cst_13 = arith.constant dense<0.000000e+00> : vector<16xf32>
    %18 = vector.multi_reduction <add>, %17, %cst_13 [1] : vector<16x32xf32> to vector<16xf32>
    %19 = vector.shape_cast %18 : vector<16xf32> to vector<16x1xf32>
    %20 = tpu.reciprocal %19 : vector<16x1xf32> -> vector<16x1xf32>
    %21 = vector.broadcast %20 : vector<16x1xf32> to vector<16x32xf32>
    %22 = arith.mulf %17, %21 : vector<16x32xf32>
    %c0_14 = arith.constant 0 : index
    %c0_15 = arith.constant 0 : index
    %23 = vector.load %arg6[%c0_14, %c0_15] : memref<16x32xf32, #tpu.memory_space<vmem>>, vector<16x32xf32>
    tpu.vector_store %arg6[%c0_14, %c0_15], %22 {strides = array<i32>} : memref<16x32xf32, #tpu.memory_space<vmem>>, vector<16x32xf32>,
    return
  }
  func.func @transform_0(%arg0: i32) -> (i32, i32, i32) {
    %c0_i32 = arith.constant 0 : i32
    %c0_i32_0 = arith.constant 0 : i32
    %c0_i32_1 = arith.constant 0 : i32
    return %arg0, %c0_i32, %c0_i32_0 : i32, i32, i32
  }
  func.func @transform_1(%arg0: i32) -> (i32, i32) {
    %c0_i32 = arith.constant 0 : i32
    %c0_i32_0 = arith.constant 0 : i32
    %c0_i32_1 = arith.constant 0 : i32
    return %c0_i32, %c0_i32_0 : i32, i32
  }
  func.func @transform_2(%arg0: i32) -> (i32, i32) {
    %c0_i32 = arith.constant 0 : i32
    %c0_i32_0 = arith.constant 0 : i32
    %c0_i32_1 = arith.constant 0 : i32
    return %c0_i32, %c0_i32_0 : i32, i32
  }
  func.func @transform_3(%arg0: i32) -> (i32, i32) {
    %c0_i32 = arith.constant 0 : i32
    %c0_i32_0 = arith.constant 0 : i32
    %c0_i32_1 = arith.constant 0 : i32
    return %c0_i32, %c0_i32_0 : i32, i32
  }
  func.func @transform_4(%arg0: i32) -> (i32, i32) {
    %c0_i32 = arith.constant 0 : i32
    %c0_i32_0 = arith.constant 0 : i32
    %c0_i32_1 = arith.constant 0 : i32
    return %c0_i32, %c0_i32_0 : i32, i32
  }
  func.func @transform_5(%arg0: i32) -> (i32, i32) {
    %c0_i32 = arith.constant 0 : i32
    %c0_i32_0 = arith.constant 0 : i32
    return %arg0, %c0_i32 : i32, i32
  }
}

</mosaic_0001>

<bundles_post_ra>
// kernel: tpu_custom_call.1
= control target key start
LH: loop header
LB: loop body
LE: loop exit
PB: predicated region body
PF: predicated region fallthrough
CT: control target
= control target key end

     0   :  { %10 = vsyncpa [#allocation3], 0  ;;  %s1319_s0 = inlined_call_operand.hbm [shape: f32[16,32,64], index: 0, kind: input, shape index: {}]   ;;  %s1320_s1 = inlined_call_operand.vmem [shape: f32[32,8], index: 1, kind: input, shape index: {}]   ;;  %s1321_s2 = inlined_call_operand.vmem [shape: f32[1,8], index: 2, kind: input, shape index: {}]   ;;  %s1322_s3 = inlined_call_operand.vmem [shape: f32[8,32], index: 3, kind: input, shape index: {}]   ;;  %s1323_s4 = inlined_call_operand.vmem [shape: f32[1,32], index: 4, kind: input, shape index: {}]   ;;  %s1324_s5 = inlined_call_operand.hbm [shape: f32[16,32], index: 5, kind: output, shape index: {}]  }
   0x1   :  { %11 = vsyncpa [#allocation4], 0  ;;  %s1016_s18 = smov [#allocation2]   ;;  %s968_s22 = scalar_lea.hbm %s1319_s0, 8192 }
   0x2   :  { %s17_s19 = sshll.u32 %s1016_s18, 4  ;;  %p969_p0 = scmp.ne.s32.totalorder %s1319_s0, %s968_s22  ;;  %s18_s19 = int_to_ptr.vmem [resolvable:$true] %s17_s19 }
   0x3   :  { %p972_p1 = scmp.lt.u32.totalorder %s968_s22, %s1319_s0 }
   0x5   :  { %p974_p2 = pnand %p972_p1, %p969_p0 }
   0x7   :  { %977 = shalt.err (!%p974_p2)
}
   0x8   :  { %s978_s27 = scalar_lea.vmem %s18_s19, 8192  ;;  %p983_p4 = scmp.lt.s32.totalorder %s18_s19, %s18_s19 }
   0x9   :  { %p979_p3 = scmp.ne.s32.totalorder %s18_s19, %s978_s27  ;;  %p984_p5 = scmp.lt.s32.totalorder %s978_s27, %s978_s27 }
   0xb   :  { %p985_p6 = por %p984_p5, %p983_p4 }
   0xd   :  { %p986_p7 = pnand %p985_p6, %p979_p3 }
   0xf   :  { %989 = shalt.err (!%p986_p7)
}
  0x10   :  { %s1017_s28 = smov 128   ;;  %s1018_s29 = smov 8  }
  0x11   :  { %23 = dma.hbm_to_vmem [thread:$0]  %s1319_s0, 8192, %s18_s19, [#allocation3], %s1017_s28, %s1017_s28, %s1018_s29  }
  0x12   :  { %1012 = dma.done.wait [#allocation3], 8192  }
  0x13   :  { %1013 = vsyncadd [#allocation3], 4294959104  ;;  %vm99_vm0 = vcmask 523264   ;;  %v39_v0 = vld [vmem:[#allocation2 + $0x20] sm:$0xff]  ;;  %v40_v2 = vld [vmem:[#allocation2 + $0x28] sm:$0xff]  ;;  %vm378_vm1 = vcmask 130112  }
  0x14   :  { %v35_v1 = vld [vmem:[#allocation2] sm:$0xff]  ;;  %v112_v3 = vsel %vm99_vm0, %v39_v0, 0.0  ;;  %v36_v5 = vld [vmem:[#allocation2 + $0x8] sm:$0xff]  ;;  %v115_v6 = vsel %vm99_vm0, %v40_v2, 0.0  ;;  %v41_v8 = vld [vmem:[#allocation2 + $0x30] sm:$0xff]  ;;  %vm385_vm2 = vcmask 195712  }
  0x15   :  { %v100_v4 = vsel %vm99_vm0, %v35_v1, 0.0  ;;  %113 = vadd.xlane.f32.xlu1 %v112_v3  ;;  %v103_v7 = vsel %vm99_vm0, %v36_v5, 0.0  ;;  %v37_v9 = vld [vmem:[#allocation2 + $0x10] sm:$0xff]  ;;  %v118_v10 = vsel %vm99_vm0, %v41_v8, 0.0  ;;  %v44_v12 = vld [vmem:[#allocation2 + $0x48] sm:$0xff]  ;;  %v43_v13 = vld [vmem:[#allocation2 + $0x40] sm:$0xff] }
  0x16   :  { %101 = vadd.xlane.f32.xlu0 %v100_v4  ;;  %v106_v11 = vsel %vm99_vm0, %v37_v9, 0.0  ;;  %v127_v14 = vsel %vm99_vm0, %v44_v12, 0.0  ;;  %v124_v15 = vsel %vm99_vm0, %v43_v13, 0.0  ;;  %v68_v16 = vld [vmem:[#allocation2 + $0x108] sm:$0xff]  ;;  %v67_v17 = vld [vmem:[#allocation2 + $0x100] sm:$0xff]  ;;  %v42_v24 = vld [vmem:[#allocation2 + $0x38] sm:$0xff] }
  0x17   :  { %v199_v18 = vsel %vm99_vm0, %v68_v16, 0.0  ;;  %v196_v19 = vsel %vm99_vm0, %v67_v17, 0.0  ;;  %v72_v20 = vld [vmem:[#allocation2 + $0x128] sm:$0xff]  ;;  %v71_v21 = vld [vmem:[#allocation2 + $0x120] sm:$0xff]  ;;  %v38_v25 = vld [vmem:[#allocation2 + $0x18] sm:$0xff]  ;;  %v121_v26 = vsel %vm99_vm0, %v42_v24, 0.0 }
  0x18   :  { %v211_v22 = vsel %vm99_vm0, %v72_v20, 0.0  ;;  %v208_v23 = vsel %vm99_vm0, %v71_v21, 0.0  ;;  %v109_v27 = vsel %vm99_vm0, %v38_v25, 0.0  ;;  %v47_v28 = vld [vmem:[#allocation2 + $0x60] sm:$0xff]  ;;  %v45_v29 = vld [vmem:[#allocation2 + $0x50] sm:$0xff]  ;;  %v48_v33 = vld [vmem:[#allocation2 + $0x68] sm:$0xff] }
  0x19   :  { %116 = vadd.xlane.f32.xlu1 %v115_v6  ;;  %v136_v30 = vsel %vm99_vm0, %v47_v28, 0.0  ;;  %v130_v31 = vsel %vm99_vm0, %v45_v29, 0.0  ;;  %v69_v32 = vld [vmem:[#allocation2 + $0x110] sm:$0xff]  ;;  %v139_v35 = vsel %vm99_vm0, %v48_v33, 0.0  ;;  %v75_v36 = vld [vmem:[#allocation2 + $0x140] sm:$0xff]  ;;  %v46_v40 = vld [vmem:[#allocation2 + $0x58] sm:$0xff] }
  0x1a   :  { %104 = vadd.xlane.f32.xlu0 %v103_v7  ;;  %v202_v34 = vsel %vm99_vm0, %v69_v32, 0.0  ;;  %v73_v37 = vld [vmem:[#allocation2 + $0x130] sm:$0xff]  ;;  %v220_v38 = vsel %vm99_vm0, %v75_v36, 0.0  ;;  %v76_v41 = vld [vmem:[#allocation2 + $0x148] sm:$0xff]  ;;  %v133_v42 = vsel %vm99_vm0, %v46_v40, 0.0  ;;  %v51_v44 = vld [vmem:[#allocation2 + $0x80] sm:$0xff] }
  0x1b   :  { %v214_v39 = vsel %vm99_vm0, %v73_v37, 0.0  ;;  %v223_v43 = vsel %vm99_vm0, %v76_v41, 0.0  ;;  %v49_v45 = vld [vmem:[#allocation2 + $0x70] sm:$0xff]  ;;  %v148_v46 = vsel %vm99_vm0, %v51_v44, 0.0  ;;  %v70_v48 = vld [vmem:[#allocation2 + $0x118] sm:$0xff]  ;;  %v52_v49 = vld [vmem:[#allocation2 + $0x88] sm:$0xff] }
  0x1c   :  { %v142_v47 = vsel %vm99_vm0, %v49_v45, 0.0  ;;  %v205_v50 = vsel %vm99_vm0, %v70_v48, 0.0  ;;  %v151_v51 = vsel %vm99_vm0, %v52_v49, 0.0  ;;  %v77_v52 = vld [vmem:[#allocation2 + $0x150] sm:$0xff]  ;;  %v74_v53 = vld [vmem:[#allocation2 + $0x138] sm:$0xff]  ;;  %v80_v56 = vld [vmem:[#allocation2 + $0x168] sm:$0xff] }
  0x1d   :  { %119 = vadd.xlane.f32.xlu1 %v118_v10  ;;  %v226_v54 = vsel %vm99_vm0, %v77_v52, 0.0  ;;  %v217_v55 = vsel %vm99_vm0, %v74_v53, 0.0  ;;  %v79_v57 = vld [vmem:[#allocation2 + $0x160] sm:$0xff]  ;;  %v235_v58 = vsel %vm99_vm0, %v80_v56, 0.0  ;;  %v53_v60 = vld [vmem:[#allocation2 + $0x90] sm:$0xff]  ;;  %v50_v61 = vld [vmem:[#allocation2 + $0x78] sm:$0xff] }
  0x1e   :  { %107 = vadd.xlane.f32.xlu0 %v106_v11  ;;  %v232_v59 = vsel %vm99_vm0, %v79_v57, 0.0  ;;  %v154_v62 = vsel %vm99_vm0, %v53_v60, 0.0  ;;  %v145_v63 = vsel %vm99_vm0, %v50_v61, 0.0  ;;  %v56_v0 = vld [vmem:[#allocation2 + $0xa8] sm:$0xff]  ;;  %v55_v1 = vld [vmem:[#allocation2 + $0xa0] sm:$0xff]  ;;  %v81_v4 = vld [vmem:[#allocation2 + $0x170] sm:$0xff] }
  0x1f   :  { %v163_v2 = vsel %vm99_vm0, %v56_v0, 0.0  ;;  %v160_v3 = vsel %vm99_vm0, %v55_v1, 0.0  ;;  %v78_v5 = vld [vmem:[#allocation2 + $0x158] sm:$0xff]  ;;  %v238_v6 = vsel %vm99_vm0, %v81_v4, 0.0  ;;  %v84_v8 = vld [vmem:[#allocation2 + $0x188] sm:$0xff]  ;;  %v83_v9 = vld [vmem:[#allocation2 + $0x180] sm:$0xff]  ;;  %v367_v0 = vlaneseq }
  0x20   :  { %v229_v7 = vsel %vm99_vm0, %v78_v5, 0.0  ;;  %v247_v10 = vsel %vm99_vm0, %v84_v8, 0.0  ;;  %v244_v11 = vsel %vm99_vm0, %v83_v9, 0.0  ;;  %v57_v12 = vld [vmem:[#allocation2 + $0xb0] sm:$0xff]  ;;  %v54_v13 = vld [vmem:[#allocation2 + $0x98] sm:$0xff]  ;;  %v60_v16 = vld [vmem:[#allocation2 + $0xc8] sm:$0xff] }
  0x21   :  { %128 = vadd.xlane.f32.xlu1 %v127_v14  ;;  %v166_v14 = vsel %vm99_vm0, %v57_v12, 0.0  ;;  %v59_v17 = vld [vmem:[#allocation2 + $0xc0] sm:$0xff]  ;;  %v85_v20 = vld [vmem:[#allocation2 + $0x190] sm:$0xff]  ;;  %v82_v21 = vld [vmem:[#allocation2 + $0x178] sm:$0xff]  ;;  %v368_v4 = vand.u32 127, %v367_v0  ;;  %v370_v8 = vshrl.u32 %v367_v0, 7 }
  0x22   :  { %125 = vadd.xlane.f32.xlu0 %v124_v15  ;;  %v157_v15 = vsel %vm99_vm0, %v54_v13, 0.0  ;;  %v88_v24 = vld [vmem:[#allocation2 + $0x1a8] sm:$0xff]  ;;  %v87_v25 = vld [vmem:[#allocation2 + $0x1a0] sm:$0xff]  ;;  %v61_v28 = vld [vmem:[#allocation2 + $0xd0] sm:$0xff]  ;;  %vm392_vm3 = vcmask 261312   ;;  %vm679_vm4 = vcmask 1041409  }
  0x23   :  { %v58_v29 = vld [vmem:[#allocation2 + $0xb8] sm:$0xff]  ;;  %v64_v32 = vld [vmem:[#allocation2 + $0xe8] sm:$0xff]  ;;  %v63_v33 = vld [vmem:[#allocation2 + $0xe0] sm:$0xff]  ;;  %v373_v9 = vadd.s32 4294967288, %v368_v4  ;;  %v380_v12 = vadd.s32 4294967280, %v368_v4  ;;  %v1141_v13 = vsub.s32 %v368_v4, %v370_v8  ;;  %vm681_vm5 = vcmask 1042434  }
  0x24   :  { %v89_v36 = vld [vmem:[#allocation2 + $0x1b0] sm:$0xff]  ;;  %v86_v37 = vld [vmem:[#allocation2 + $0x198] sm:$0xff]  ;;  %v92_v40 = vld [vmem:[#allocation2 + $0x1c8] sm:$0xff]  ;;  %vm683_vm6 = vcmask 1043459   ;;  %vm685_vm7 = vcmask 1044484   ;;  %vm687_vm8 = vcmask 1045509  }
  0x25   :  { %200 = vadd.xlane.f32.xlu1 %v199_v18  ;;  %v175_v18 = vsel %vm99_vm0, %v60_v16, 0.0  ;;  %v91_v41 = vld [vmem:[#allocation2 + $0x1c0] sm:$0xff]  ;;  %v65_v44 = vld [vmem:[#allocation2 + $0xf0] sm:$0xff]  ;;  %v62_v45 = vld [vmem:[#allocation2 + $0xd8] sm:$0xff]  ;;  %vm689_vm9 = vcmask 1046534   ;;  %vm691_vm10 = vcmask 1047559  }
  0x26   :  { %197 = vadd.xlane.f32.xlu0 %v196_v19  ;;  %v172_v19 = vsel %vm99_vm0, %v59_v17, 0.0  ;;  %v93_v48 = vld [vmem:[#allocation2 + $0x1d0] sm:$0xff]  ;;  %v90_v49 = vld [vmem:[#allocation2 + $0x1b8] sm:$0xff]  ;;  %v96_v52 = vld [vmem:[#allocation2 + $0x1e8] sm:$0xff]  ;;  %v1145_v17 = vsub.s32 %v380_v12, %v370_v8  ;;  %vm700_vm11 = vcmask 261120   ;;  %vm790_vm12 = vcmask 64512  }
  0x27   :  { %v95_v53 = vld [vmem:[#allocation2 + $0x1e0] sm:$0xff]  ;;  %v94_v56 = vld [vmem:[#allocation2 + $0x1d8] sm:$0xff]  ;;  %v97_v60 = vld [vmem:[#allocation2 + $0x1f0] sm:$0xff] }
  0x28   :  { %v66_v57 = vld [vmem:[#allocation2 + $0xf8] sm:$0xff]  ;;  %v292_v1 = vld [vmem:[%s1320_s1] sm:$0xff]  ;;  %v294_v5 = vld [vmem:[%s1320_s1 + $0x10] sm:$0xff] }
  0x29   :  { %212 = vadd.xlane.f32.xlu1 %v211_v22  ;;  %v250_v22 = vsel %vm99_vm0, %v85_v20, 0.0  ;;  %v98_v61 = vld [vmem:[#allocation2 + $0x1f8] sm:$0xff] }
  0x2a   :  { %209 = vadd.xlane.f32.xlu0 %v208_v23  ;;  %v241_v23 = vsel %vm99_vm0, %v82_v21, 0.0 }
  0x2d   :  { %122 = vadd.xlane.f32.xlu1 %v121_v26  ;;  %v259_v26 = vsel %vm99_vm0, %v88_v24, 0.0 }
  0x2e   :  { %110 = vadd.xlane.f32.xlu0 %v109_v27  ;;  %v256_v27 = vsel %vm99_vm0, %v87_v25, 0.0 }
  0x31   :  { %137 = vadd.xlane.f32.xlu1 %v136_v30  ;;  %v178_v30 = vsel %vm99_vm0, %v61_v28, 0.0 }
  0x32   :  { %131 = vadd.xlane.f32.xlu0 %v130_v31  ;;  %v169_v31 = vsel %vm99_vm0, %v58_v29, 0.0 }
  0x35   :  { %203 = vadd.xlane.f32.xlu1 %v202_v34  ;;  %v187_v34 = vsel %vm99_vm0, %v64_v32, 0.0 }
  0x36   :  { %140 = vadd.xlane.f32.xlu0 %v139_v35  ;;  %v184_v35 = vsel %vm99_vm0, %v63_v33, 0.0 }
  0x39   :  { %221 = vadd.xlane.f32.xlu1 %v220_v38  ;;  %v262_v38 = vsel %vm99_vm0, %v89_v36, 0.0 }
  0x3a   :  { %215 = vadd.xlane.f32.xlu0 %v214_v39  ;;  %v253_v39 = vsel %vm99_vm0, %v86_v37, 0.0 }
  0x3d   :  { %134 = vadd.xlane.f32.xlu1 %v133_v42  ;;  %v271_v42 = vsel %vm99_vm0, %v92_v40, 0.0 }
  0x3e   :  { %224 = vadd.xlane.f32.xlu0 %v223_v43  ;;  %v268_v43 = vsel %vm99_vm0, %v91_v41, 0.0 }
  0x41   :  { %149 = vadd.xlane.f32.xlu1 %v148_v46  ;;  %v190_v46 = vsel %vm99_vm0, %v65_v44, 0.0 }
  0x42   :  { %143 = vadd.xlane.f32.xlu0 %v142_v47  ;;  %v181_v47 = vsel %vm99_vm0, %v62_v45, 0.0 }
  0x45   :  { %206 = vadd.xlane.f32.xlu1 %v205_v50  ;;  %v274_v50 = vsel %vm99_vm0, %v93_v48, 0.0 }
  0x46   :  { %152 = vadd.xlane.f32.xlu0 %v151_v51  ;;  %v265_v51 = vsel %vm99_vm0, %v90_v49, 0.0 }
  0x49   :  { %227 = vadd.xlane.f32.xlu1 %v226_v54  ;;  %v283_v54 = vsel %vm99_vm0, %v96_v52, 0.0 }
  0x4a   :  { %218 = vadd.xlane.f32.xlu0 %v217_v55  ;;  %v280_v55 = vsel %vm99_vm0, %v95_v53, 0.0 }
  0x4d   :  { %236 = vadd.xlane.f32.xlu1 %v235_v58  ;;  %v277_v58 = vsel %vm99_vm0, %v94_v56, 0.0 }
  0x4e   :  { %233 = vadd.xlane.f32.xlu0 %v232_v59  ;;  %v193_v59 = vsel %vm99_vm0, %v66_v57, 0.0 }
  0x51   :  { %155 = vadd.xlane.f32.xlu1 %v154_v62  ;;  %v286_v62 = vsel %vm99_vm0, %v97_v60, 0.0 }
  0x52   :  { %146 = vadd.xlane.f32.xlu0 %v145_v63  ;;  %v289_v63 = vsel %vm99_vm0, %v98_v61, 0.0 }
  0x55   :  { %164 = vadd.xlane.f32.xlu1 %v163_v2  ;;  %v293_v2 = vld [vmem:[%s1320_s1 + $0x8] sm:$0xff] }
  0x56   :  { %161 = vadd.xlane.f32.xlu0 %v160_v3  ;;  %v944_v3 = vpack.c.bf16 %v293_v2, %v292_v1 }
  0x58   :  { %945 = vmatprep.subr.bf16.mxu0 %v944_v3 }
  0x59   :  { %239 = vadd.xlane.f32.xlu1 %v238_v6  ;;  %947 = vmatpush3.bf16.msra.mxu0 %v944_v3  ;;  %v295_v6 = vld [vmem:[%s1320_s1 + $0x18] sm:$0xff] }
  0x5a   :  { %230 = vadd.xlane.f32.xlu0 %v229_v7  ;;  %v948_v7 = vpack.c.bf16 %v295_v6, %v294_v5 }
  0x5c   :  { %949 = vmatprep.subr.bf16.mxu0 %v948_v7 }
  0x5d   :  { %248 = vadd.xlane.f32.xlu1 %v247_v10  ;;  %951 = vmatpush3.bf16.msra.mxu0 %v948_v7 }
  0x5e   :  { %245 = vadd.xlane.f32.xlu0 %v244_v11 }
  0x61   :  { %167 = vadd.xlane.f32.xlu1 %v166_v14  ;;  %v1143_v14 = vsub.s32 %v373_v9, %v370_v8 }
  0x62   :  { %158 = vadd.xlane.f32.xlu0 %v157_v15 }
  0x65   :  { %176 = vadd.xlane.f32.xlu1 %v175_v18 }
  0x66   :  { %173 = vadd.xlane.f32.xlu0 %v172_v19 }
  0x69   :  { %251 = vadd.xlane.f32.xlu1 %v250_v22 }
  0x6a   :  { %242 = vadd.xlane.f32.xlu0 %v241_v23 }
  0x6d   :  { %260 = vadd.xlane.f32.xlu1 %v259_v26 }
  0x6e   :  { %257 = vadd.xlane.f32.xlu0 %v256_v27 }
  0x71   :  { %179 = vadd.xlane.f32.xlu1 %v178_v30 }
  0x72   :  { %170 = vadd.xlane.f32.xlu0 %v169_v31 }
  0x75   :  { %188 = vadd.xlane.f32.xlu1 %v187_v34 }
  0x76   :  { %185 = vadd.xlane.f32.xlu0 %v184_v35 }
  0x79   :  { %263 = vadd.xlane.f32.xlu1 %v262_v38 }
  0x7a   :  { %254 = vadd.xlane.f32.xlu0 %v253_v39  ;;  %v387_v39 = vadd.s32 4294967272, %v368_v4 }
  0x7c   :  { %v1165_v45 = vsub.s32 %v387_v39, %v370_v8 }
  0x7d   :  { %272 = vadd.xlane.f32.xlu1 %v271_v42 }
  0x7e   :  { %269 = vadd.xlane.f32.xlu0 %v268_v43 }
  0x81   :  { %191 = vadd.xlane.f32.xlu1 %v190_v46 }
  0x82   :  { %182 = vadd.xlane.f32.xlu0 %v181_v47 }
  0x85   :  { %275 = vadd.xlane.f32.xlu1 %v274_v50 }
  0x86   :  { %266 = vadd.xlane.f32.xlu0 %v265_v51 }
  0x89   :  { %284 = vadd.xlane.f32.xlu1 %v283_v54 }
  0x8a   :  { %281 = vadd.xlane.f32.xlu0 %v280_v55 }
  0x8d   :  { %278 = vadd.xlane.f32.xlu1 %v277_v58 }
  0x8e   :  { %194 = vadd.xlane.f32.xlu0 %v193_v59 }
  0x91   :  { %290 = vadd.xlane.f32.xlu1 %v289_v63 }
  0x92   :  { %287 = vadd.xlane.f32.xlu0 %v286_v62 }
  0xa2   :  { %v114_v10 = vpop.xlane.xlu1 %113 }
  0xa3   :  { %v102_v11 = vpop.xlane.xlu0 %101  ;;  %v397_v18 = vrot.slane %v114_v10, %v1141_v13 }
  0xa4   :  { %v372_v19 = vrot.slane %v102_v11, %v1141_v13 }
  0xa6   :  { %v117_v15 = vpop.xlane.xlu1 %116 }
  0xa7   :  { %v105_v16 = vpop.xlane.xlu0 %104  ;;  %v401_v20 = vrot.slane %v117_v15, %v1143_v14 }
  0xa8   :  { %v377_v21 = vrot.slane %v105_v16, %v1143_v14 }
  0xa9   :  { %v402_v22 = vsel %vm378_vm1, %v401_v20, %v397_v18 }
  0xaa   :  { %v379_v23 = vsel %vm378_vm1, %v377_v21, %v372_v19  ;;  %v120_v24 = vpop.xlane.xlu1 %119 }
  0xab   :  { %v108_v25 = vpop.xlane.xlu0 %107  ;;  %v406_v26 = vrot.slane %v120_v24, %v1145_v17 }
  0xac   :  { %v384_v27 = vrot.slane %v108_v25, %v1145_v17 }
  0xad   :  { %v407_v28 = vsel %vm385_vm2, %v406_v26, %v402_v22 }
  0xae   :  { %v386_v29 = vsel %vm385_vm2, %v384_v27, %v379_v23  ;;  %v129_v30 = vpop.xlane.xlu1 %128 }
  0xaf   :  { %v126_v31 = vpop.xlane.xlu0 %125  ;;  %v420_v32 = vrot.slane %v129_v30, %v1143_v14 }
  0xb0   :  { %v416_v33 = vrot.slane %v126_v31, %v1141_v13 }
  0xb2   :  { %v421_v34 = vsel %vm378_vm1, %v420_v32, %v416_v33  ;;  %v201_v35 = vpop.xlane.xlu1 %200 }
  0xb3   :  { %v198_v36 = vpop.xlane.xlu0 %197  ;;  %v534_v37 = vrot.slane %v201_v35, %v1143_v14 }
  0xb4   :  { %v530_v38 = vrot.slane %v198_v36, %v1141_v13 }
  0xb6   :  { %v535_v40 = vsel %vm378_vm1, %v534_v37, %v530_v38  ;;  %v213_v41 = vpop.xlane.xlu1 %212 }
  0xb7   :  { %v210_v42 = vpop.xlane.xlu0 %209  ;;  %v553_v43 = vrot.slane %v213_v41, %v1143_v14 }
  0xb8   :  { %v549_v44 = vrot.slane %v210_v42, %v1141_v13 }
  0xba   :  { %v554_v46 = vsel %vm378_vm1, %v553_v43, %v549_v44  ;;  %v123_v47 = vpop.xlane.xlu1 %122 }
  0xbb   :  { %v111_v48 = vpop.xlane.xlu0 %110  ;;  %v411_v49 = vrot.slane %v123_v47, %v1165_v45 }
  0xbc   :  { %v391_v50 = vrot.slane %v111_v48, %v1165_v45 }
  0xbd   :  { %v412_v51 = vsel %vm392_vm3, %v411_v49, %v407_v28 }
  0xbe   :  { %v393_v52 = vsel %vm392_vm3, %v391_v50, %v386_v29  ;;  %v138_v54 = vpop.xlane.xlu1 %137 }
  0xbf   :  { %v680_v53 = vsel %vm679_vm4, %v412_v51, %v393_v52  ;;  %v132_v55 = vpop.xlane.xlu0 %131  ;;  %v435_v60 = vrot.slane %v138_v54, %v1141_v13 }
  0xc0   :  { %v425_v56 = vrot.slane %v132_v55, %v1145_v17 }
  0xc2   :  { %v426_v57 = vsel %vm385_vm2, %v425_v56, %v421_v34  ;;  %v204_v58 = vpop.xlane.xlu1 %203 }
  0xc3   :  { %v141_v59 = vpop.xlane.xlu0 %140  ;;  %v539_v61 = vrot.slane %v204_v58, %v1145_v17 }
  0xc4   :  { %v439_v62 = vrot.slane %v141_v59, %v1143_v14 }
  0xc5   :  { %v540_v63 = vsel %vm385_vm2, %v539_v61, %v535_v40 }
  0xc6   :  { %v440_v0 = vsel %vm378_vm1, %v439_v62, %v435_v60  ;;  %v222_v1 = vpop.xlane.xlu1 %221 }
  0xc7   :  { %v216_v2 = vpop.xlane.xlu0 %215  ;;  %v568_v7 = vrot.slane %v222_v1, %v1141_v13 }
  0xc8   :  { %v558_v3 = vrot.slane %v216_v2, %v1145_v17 }
  0xca   :  { %v559_v4 = vsel %vm385_vm2, %v558_v3, %v554_v46  ;;  %v135_v5 = vpop.xlane.xlu1 %134 }
  0xcb   :  { %v225_v6 = vpop.xlane.xlu0 %224  ;;  %v430_v8 = vrot.slane %v135_v5, %v1165_v45 }
  0xcc   :  { %v572_v9 = vrot.slane %v225_v6, %v1143_v14 }
  0xcd   :  { %v431_v10 = vsel %vm392_vm3, %v430_v8, %v426_v57 }
  0xce   :  { %v573_v11 = vsel %vm378_vm1, %v572_v9, %v568_v7  ;;  %v682_v12 = vsel %vm681_vm5, %v431_v10, %v680_v53  ;;  %v150_v15 = vpop.xlane.xlu1 %149 }
  0xcf   :  { %v144_v16 = vpop.xlane.xlu0 %143  ;;  %v454_v22 = vrot.slane %v150_v15, %v1141_v13 }
  0xd0   :  { %v444_v18 = vrot.slane %v144_v16, %v1145_v17 }
  0xd2   :  { %v445_v19 = vsel %vm385_vm2, %v444_v18, %v440_v0  ;;  %v207_v20 = vpop.xlane.xlu1 %206 }
  0xd3   :  { %v153_v21 = vpop.xlane.xlu0 %152  ;;  %v544_v23 = vrot.slane %v207_v20, %v1165_v45 }
  0xd4   :  { %v458_v24 = vrot.slane %v153_v21, %v1143_v14 }
  0xd5   :  { %v545_v25 = vsel %vm392_vm3, %v544_v23, %v540_v63 }
  0xd6   :  { %v459_v26 = vsel %vm378_vm1, %v458_v24, %v454_v22  ;;  %v228_v27 = vpop.xlane.xlu1 %227 }
  0xd7   :  { %v219_v28 = vpop.xlane.xlu0 %218  ;;  %v577_v29 = vrot.slane %v228_v27, %v1145_v17 }
  0xd8   :  { %v563_v30 = vrot.slane %v219_v28, %v1165_v45 }
  0xd9   :  { %v578_v31 = vsel %vm385_vm2, %v577_v29, %v573_v11 }
  0xda   :  { %v564_v32 = vsel %vm392_vm3, %v563_v30, %v559_v4  ;;  %v237_v34 = vpop.xlane.xlu1 %236 }
  0xdb   :  { %v693_v33 = vsel %vm679_vm4, %v564_v32, %v545_v25  ;;  %v234_v35 = vpop.xlane.xlu0 %233  ;;  %v591_v10 = vrot.slane %v237_v34, %v1143_v14 }
  0xdc   :  { %v587_v11 = vrot.slane %v234_v35, %v1141_v13 }
  0xde   :  { %v156_v36 = vpop.xlane.xlu1 %155 }
  0xdf   :  { %v147_v37 = vpop.xlane.xlu0 %146  ;;  %v463_v51 = vrot.slane %v156_v36, %v1145_v17 }
  0xe0   :  { %v449_v38 = vrot.slane %v147_v37, %v1165_v45 }
  0xe1   :  { %v464_v55 = vsel %vm385_vm2, %v463_v51, %v459_v26  ;;  %v592_v26 = vsel %vm378_vm1, %v591_v10, %v587_v11 }
  0xe2   :  { %v450_v39 = vsel %vm392_vm3, %v449_v38, %v445_v19  ;;  %v165_v41 = vpop.xlane.xlu1 %164 }
  0xe3   :  { %v684_v40 = vsel %vm683_vm6, %v450_v39, %v682_v12  ;;  %v162_v42 = vpop.xlane.xlu0 %161  ;;  %v477_v12 = vrot.slane %v165_v41, %v1143_v14 }
  0xe4   :  { %v473_v15 = vrot.slane %v162_v42, %v1141_v13 }
  0xe6   :  { %v240_v43 = vpop.xlane.xlu1 %239  ;;  %v478_v29 = vsel %vm378_vm1, %v477_v12, %v473_v15 }
  0xe7   :  { %v231_v44 = vpop.xlane.xlu0 %230  ;;  %v596_v16 = vrot.slane %v240_v43, %v1145_v17 }
  0xe8   :  { %v582_v46 = vrot.slane %v231_v44, %v1165_v45 }
  0xe9   :  { %v597_v30 = vsel %vm385_vm2, %v596_v16, %v592_v26 }
  0xea   :  { %v583_v47 = vsel %vm392_vm3, %v582_v46, %v578_v31  ;;  %v249_v49 = vpop.xlane.xlu1 %248 }
  0xeb   :  { %v1206_v48 = vsel %vm681_vm5, %v583_v47, %v693_v33  ;;  %v246_v50 = vpop.xlane.xlu0 %245  ;;  %v610_v18 = vrot.slane %v249_v49, %v1143_v14 }
  0xec   :  { %v606_v19 = vrot.slane %v246_v50, %v1141_v13 }
  0xee   :  { %v168_v52 = vpop.xlane.xlu1 %167  ;;  %v611_v31 = vsel %vm378_vm1, %v610_v18, %v606_v19 }
  0xef   :  { %v159_v53 = vpop.xlane.xlu0 %158  ;;  %v482_v20 = vrot.slane %v168_v52, %v1145_v17 }
  0xf0   :  { %v468_v54 = vrot.slane %v159_v53, %v1165_v45 }
  0xf1   :  { %v483_v33 = vsel %vm385_vm2, %v482_v20, %v478_v29  ;;  %v916_v29 = vld [vmem:[%s1323_s4] ss:$0 sm:$0xff] }
  0xf2   :  { %v469_v56 = vsel %vm392_vm3, %v468_v54, %v464_v55  ;;  %v177_v57 = vpop.xlane.xlu1 %176 }
  0xf3   :  { %v174_v58 = vpop.xlane.xlu0 %173  ;;  %v1213_v59 = vsel %vm685_vm7, %v469_v56, %v684_v40  ;;  %v496_v23 = vrot.slane %v177_v57, %v1143_v14 }
  0xf4   :  { %v492_v24 = vrot.slane %v174_v58, %v1141_v13 }
  0xf6   :  { %v252_v60 = vpop.xlane.xlu1 %251  ;;  %v497_v39 = vsel %vm378_vm1, %v496_v23, %v492_v24 }
  0xf7   :  { %v243_v61 = vpop.xlane.xlu0 %242  ;;  %v615_v25 = vrot.slane %v252_v60, %v1145_v17 }
  0xf8   :  { %v601_v27 = vrot.slane %v243_v61, %v1165_v45 }
  0xf9   :  { %v616_v40 = vsel %vm385_vm2, %v615_v25, %v611_v31 }
  0xfa   :  { %v261_v62 = vpop.xlane.xlu1 %260  ;;  %v602_v43 = vsel %vm392_vm3, %v601_v27, %v597_v30 }
  0xfb   :  { %v258_v63 = vpop.xlane.xlu0 %257  ;;  %v629_v34 = vrot.slane %v261_v62, %v1143_v14 }
  0xfc   :  { %v625_v35 = vrot.slane %v258_v63, %v1141_v13 }
  0xfe   :  { %v180_v0 = vpop.xlane.xlu1 %179  ;;  %v630_v53 = vsel %vm378_vm1, %v629_v34, %v625_v35 }
  0xff   :  { %v171_v1 = vpop.xlane.xlu0 %170  ;;  %v501_v32 = vrot.slane %v180_v0, %v1145_v17 }
 0x100   :  { %v487_v28 = vrot.slane %v171_v1, %v1165_v45 }
 0x101   :  { %v502_v49 = vsel %vm385_vm2, %v501_v32, %v497_v39 }
 0x102   :  { %v189_v2 = vpop.xlane.xlu1 %188  ;;  %v488_v44 = vsel %vm392_vm3, %v487_v28, %v483_v33 }
 0x103   :  { %v186_v3 = vpop.xlane.xlu0 %185  ;;  %v515_v41 = vrot.slane %v189_v2, %v1143_v14  ;;  %v688_v63 = vsel %vm687_vm8, %v488_v44, %v1213_v59 }
 0x104   :  { %v511_v42 = vrot.slane %v186_v3, %v1141_v13 }
 0x106   :  { %v264_v4 = vpop.xlane.xlu1 %263  ;;  %v516_v60 = vsel %vm378_vm1, %v515_v41, %v511_v42 }
 0x107   :  { %v1215_v5 = vpop.xlane.xlu0 %254  ;;  %v634_v46 = vrot.slane %v264_v4, %v1145_v17 }
 0x108   :  { %v620_v50 = vrot.slane %v1215_v5, %v1165_v45 }
 0x109   :  { %v635_v0 = vsel %vm385_vm2, %v634_v46, %v630_v53 }
 0x10a   :  { %v1217_v6 = vpop.xlane.xlu1 %272  ;;  %v621_v4 = vsel %vm392_vm3, %v620_v50, %v616_v40 }
 0x10b   :  { %v270_v7 = vpop.xlane.xlu0 %269  ;;  %v648_v51 = vrot.slane %v1217_v6, %v1143_v14 }
 0x10c   :  { %v644_v52 = vrot.slane %v270_v7, %v1141_v13 }
 0x10e   :  { %v192_v8 = vpop.xlane.xlu1 %191  ;;  %v649_v5 = vsel %vm378_vm1, %v648_v51, %v644_v52 }
 0x10f   :  { %v183_v9 = vpop.xlane.xlu0 %182  ;;  %v520_v47 = vrot.slane %v192_v8, %v1145_v17 }
 0x110   :  { %v506_v36 = vrot.slane %v183_v9, %v1165_v45 }
 0x111   :  { %v521_v3 = vsel %vm385_vm2, %v520_v47, %v516_v60 }
 0x112   :  { %v276_v21 = vpop.xlane.xlu1 %275  ;;  %v507_v58 = vsel %vm392_vm3, %v506_v36, %v502_v49 }
 0x113   :  { %v267_v22 = vpop.xlane.xlu0 %266  ;;  %v653_v54 = vrot.slane %v276_v21, %v1145_v17  ;;  %v690_v7 = vsel %vm689_vm9, %v507_v58, %v688_v63 }
 0x114   :  { %v639_v55 = vrot.slane %v267_v22, %v1165_v45 }
 0x115   :  { %v654_v8 = vsel %vm385_vm2, %v653_v54, %v649_v5 }
 0x116   :  { %v285_v37 = vpop.xlane.xlu1 %284  ;;  %v640_v59 = vsel %vm392_vm3, %v639_v55, %v635_v0 }
 0x117   :  { %v282_v38 = vpop.xlane.xlu0 %281  ;;  %v667_v1 = vrot.slane %v285_v37, %v1143_v14 }
 0x118   :  { %v663_v2 = vrot.slane %v282_v38, %v1141_v13  ;;  %v695_v13 = vsel %vm683_vm6, %v602_v43, %v1206_v48 }
 0x119   :  { %v696_v16 = vsel %vm685_vm7, %v621_v4, %v695_v13 }
 0x11a   :  { %v279_v56 = vpop.xlane.xlu1 %278  ;;  %v668_v18 = vsel %vm378_vm1, %v667_v1, %v663_v2  ;;  %v697_v19 = vsel %vm687_vm8, %v640_v59, %v696_v16 }
 0x11b   :  { %v195_v57 = vpop.xlane.xlu0 %194  ;;  %v658_v61 = vrot.slane %v279_v56, %v1165_v45 }
 0x11c   :  { %v525_v62 = vrot.slane %v195_v57, %v1165_v45 }
 0x11d   :  { %v659_v11 = vsel %vm392_vm3, %v658_v61, %v654_v8 }
 0x11e   :  { %v526_v6 = vsel %vm392_vm3, %v525_v62, %v521_v3  ;;  %v291_v10 = vpop.xlane.xlu1 %290  ;;  %v698_v48 = vsel %vm689_vm9, %v659_v11, %v697_v19 }
 0x11f   :  { %v288_v9 = vpop.xlane.xlu0 %287  ;;  %v692_v14 = vsel %vm691_vm10, %v526_v6, %v690_v7  ;;  %v677_v15 = vrot.slane %v291_v10, %v1165_v45  ;;  %v913_v45 = vld [vmem:[%s1321_s2] ss:$0 sm:$0xff]  ;;  %s1019_s2 = smov [#allocation5]  }
 0x120   :  { %v672_v12 = vrot.slane %v288_v9, %v1145_v17  ;;  %936 = vmatprep.mubr.msk.f32.mxu0 %vm700_vm11, %v692_v14  ;;  %v782_v17 = vld [vmem:[%s1322_s3] sm:$0xff]  ;;  %s901_s3 = sshll.u32 %s1019_s2, 4  ;;  %s902_s3 = int_to_ptr.vmem [resolvable:$true] %s901_s3 }
 0x121   :  { %939 = vmatprep.subr.mxu1 %v782_v17  ;;  %s990_s4 = scalar_lea.vmem %s902_s3, 256  ;;  %p995_p9 = scmp.lt.s32.totalorder %s902_s3, %s902_s3 }
 0x122   :  { %v673_v20 = vsel %vm385_vm2, %v672_v12, %v668_v18  ;;  %940 = vmatpush3.msra.mxu1 %v782_v17  ;;  %p991_p8 = scmp.ne.s32.totalorder %s902_s3, %s990_s4  ;;  %p996_p10 = scmp.lt.s32.totalorder %s990_s4, %s990_s4 }
 0x123   :  { %v678_v21 = vsel %vm392_vm3, %v677_v15, %v673_v20 }
 0x124   :  { %v699_v22 = vsel %vm691_vm10, %v678_v21, %v698_v48  ;;  %p997_p11 = por %p996_p10, %p995_p9 }
 0x125   :  { %937 = vmatmul.mubr.msk.f32.vlgmr.msra.gmra.mrb[0].mxu0 %vm700_vm11, %v699_v22 }
 0x126   :  { %p998_p12 = pnand %p997_p11, %p991_p8 }
 0x1f8   :  { %v938_v23 = vpop.f32.mrb[0].mxu0 }
 0x1f9   :  { %v777_v24 = vadd.f32 %v938_v23, %v913_v45  ;;  %v771_v25 = vpop.f32.mrb[1].mxu0 }
 0x1fa   :  { %v772_v26 = vadd.f32 %v913_v45, %v771_v25 }
 0x1fc   :  { %956 = vtanh.f32 %v772_v26 }
 0x1fd   :  { %958 = vtanh.f32 %v777_v24 }
 0x206   :  { %v957_v27 = vpop.eup %956 }
 0x207   :  { %v959_v28 = vpop.eup %958  ;;  %941 = vmatprep.mubr.msk.f32.mxu1 %vm790_vm12, %v957_v27 }
 0x208   :  { %942 = vmatmul.mubr.msk.f32.vlgmr.msra.gmra.mrb[0].mxu1 %vm790_vm12, %v959_v28 }
 0x2db   :  { %v943_v30 = vpop.f32.mrb[0].mxu1 }
 0x2dc   :  { %v869_v31 = vadd.f32 %v943_v30, %v916_v29  ;;  %v863_v32 = vpop.f32.mrb[1].mxu1 }
 0x2dd   :  { %v864_v33 = vadd.f32 %v916_v29, %v863_v32 }
 0x2de   :  { %v875_v34 = vsel %vm700_vm11, %v869_v31, -inf }
 0x2df   :  { %876 = vmax.xlane.f32.xlu1 %v875_v34  ;;  %v872_v35 = vsel %vm700_vm11, %v864_v33, -inf }
 0x2e0   :  { %873 = vmax.xlane.f32.xlu0 %v872_v35 }
 0x36c   :  { %v877_v36 = vpop.xlane.xlu1 %876 }
 0x36d   :  { %v879_v37 = vsub.f32 %v869_v31, %v877_v36  ;;  %v874_v38 = vpop.xlane.xlu0 %873 }
 0x36e   :  { %v878_v39 = vsub.f32 %v864_v33, %v874_v38 }
 0x36f   :  { %v882_v40 = vmul.f32 1.442695, %v879_v37 }
 0x370   :  { %v880_v41 = vmul.f32 1.442695, %v878_v39 }
 0x371   :  { %960 = vpow2.f32 %v882_v40 }
 0x372   :  { %962 = vpow2.f32 %v880_v41 }
 0x37b   :  { %v961_v42 = vpop.eup %960 }
 0x37c   :  { %v963_v43 = vpop.eup %962  ;;  %v887_v44 = vsel %vm700_vm11, %v961_v42, 0.0 }
 0x37d   :  { %888 = vadd.xlane.f32.xlu1 %v887_v44  ;;  %v884_v46 = vsel %vm700_vm11, %v963_v43, 0.0 }
 0x37e   :  { %885 = vadd.xlane.f32.xlu0 %v884_v46 }
 0x40a   :  { %v889_v47 = vpop.xlane.xlu1 %888 }
 0x40b   :  { %964 = vrcp.f32 %v889_v47  ;;  %v886_v49 = vpop.xlane.xlu0 %885 }
 0x40c   :  { %966 = vrcp.f32 %v886_v49 }
 0x415   :  { %v965_v50 = vpop.eup %964 }
 0x416   :  { %v967_v51 = vpop.eup %966  ;;  %v893_v52 = vmul.f32 %v965_v50, %v961_v42 }
 0x417   :  { %v892_v53 = vmul.f32 %v967_v51, %v963_v43 }
 0x418   :  { %895 = vst.msk [vmem:[#allocation5 + $0x8] sm:$0xff] %vm700_vm11, %v893_v52 }
 0x419   :  { %894 = vst.msk [vmem:[#allocation5] sm:$0xff] %vm700_vm11, %v892_v53 }
 0x41a   :  { %1001 = shalt.err (!%p998_p12)
}
 0x41b   :  { %s1002_s21 = scalar_lea.hbm %s1324_s5, 256 }
 0x41c   :  { %p1003_p13 = scmp.ne.s32.totalorder %s1324_s5, %s1002_s21  ;;  %p1006_p0 = scmp.lt.u32.totalorder %s1002_s21, %s1324_s5 }
 0x41e   :  { %p1008_p1 = pnand %p1006_p0, %p1003_p13 }
 0x420   :  { %1011 = shalt.err (!%p1008_p1)
}
 0x421   :  { %907 = dma.vmem_to_hbm [thread:$0]  %s902_s3, 256, %s1324_s5, [#allocation4], %s1017_s28, %s1017_s28, %s1018_s29  }
 0x422   :  { %1014 = dma.done.wait [#allocation4], 256  }
 0x423   :  { %1015 = vsyncadd [#allocation4], 4294967040 }
 0x424   :  { %911 = vsyncpa [#allocation3], 1 }
 0x425   :  { %912 = vsyncpa [#allocation4], 1 }

</bundles_post_ra>
